<compile_context>
chip_gen: v5e
topology: v5e:2x2
jax: 0.10.0
libtpu: 0.0.40
codegen_flags: <defaults>
</compile_context>

<pallas_src>
import functools

import jax
import jax.numpy as jnp
from jax.experimental import pallas as pl
from jax.experimental.pallas import tpu as pltpu


def _round_up(n, m):
    return ((n + m - 1) // m) * m


def _block_diag(*mats):
    """Assemble a block-diagonal matrix from 2-D blocks (wrapper-side only)."""
    n_rows = sum(m.shape[0] for m in mats)
    n_cols = sum(m.shape[1] for m in mats)
    out = jnp.zeros((n_rows, n_cols), mats[0].dtype)
    r = c = 0
    for m in mats:
        out = out.at[r : r + m.shape[0], c : c + m.shape[1]].set(m)
        r += m.shape[0]
        c += m.shape[1]
    return out


def _pad_w(w, rows, cols):
    return jnp.pad(w, ((0, rows - w.shape[0]), (0, cols - w.shape[1])))


def _pad_b(b, cols):
    return jnp.pad(b, ((0, 0), (0, cols - b.shape[1])))


def gated_fusion_kernel(x_ref, y_ref, w1_ref, b1_ref, w2_ref, b2_ref, out_ref,
                        *, dim_pad):
    # In-kernel (VMEM) concat of the two modalities; avoids a wrapper-side
    # HBM-level concatenate.
    xy = jnp.concatenate([x_ref[...], y_ref[...]], axis=-1)

    # Stage 1: fused fc_x / fc_y  ->  h = [out_x_h | out_y_h]  (lane-padded)
    h = jnp.dot(xy, w1_ref[...], preferred_element_type=jnp.float32) + b1_ref[...]
    out_x_h = h[:, :dim_pad]          # lane-tile-aligned split
    out_y_h = h[:, dim_pad:]

    # x_gate=True, modalities='audio_video': gate = sigmoid(out_x_h)
    fused = jax.nn.sigmoid(out_x_h) * out_y_h

    # Stage 2: fused x_out / y_out / fc_out -> one packed, lane-dense output
    #   lhs = [out_x_h | out_y_h | fused],  W2 = block_diag(w_xo, w_yo, w_out)
    lhs = jnp.concatenate([h, fused], axis=-1)
    out_ref[...] = (
        jnp.dot(lhs, w2_ref[...], preferred_element_type=jnp.float32) + b2_ref[...]
    ).astype(out_ref.dtype)


def gated_fusion(x, y, params, *, tile_b=256):
    """params: dict of pre-transposed weights [in, out] and biases [1, out]."""
    B, input_dim = x.shape
    dim = params["w_x"].shape[1]
    output_dim = params["w_out"].shape[1]

    dim_pad = _round_up(dim, 128)          # per-modality hidden width (lanes)
    out_seg = _round_up(output_dim, 128)   # per-head output width (lanes)
    out_pad = 3 * out_seg                  # packed output slab width

    # ---- weight packing (done once per call, outside the kernel) ----
    w1 = _block_diag(_pad_w(params["w_x"], input_dim, dim_pad),
                     _pad_w(params["w_y"], input_dim, dim_pad))         # (2*in, 2*dim_pad)
    b1 = jnp.concatenate([_pad_b(params["b_x"], dim_pad),
                          _pad_b(params["b_y"], dim_pad)], axis=-1)     # (1, 2*dim_pad)
    w2 = _block_diag(_pad_w(params["w_xo"], dim_pad, out_seg),
                     _pad_w(params["w_yo"], dim_pad, out_seg),
                     _pad_w(params["w_out"], dim_pad, out_seg))         # (3*dim_pad, 3*out_seg)
    b2 = jnp.concatenate([_pad_b(params["b_xo"], out_seg),
                          _pad_b(params["b_yo"], out_seg),
                          _pad_b(params["b_out"], out_seg)], axis=-1)   # (1, 3*out_seg)

    tb = B if B <= tile_b else tile_b
    grid = (pl.cdiv(B, tb),)

    def row_spec(shape):        # tiled over the (parallel) batch axis
        return pl.BlockSpec(shape, lambda i: (i, 0))

    def full_spec(shape):       # weights/biases: resident across all batch tiles
        return pl.BlockSpec(shape, lambda i: (0, 0))

    packed = pl.pallas_call(
        functools.partial(gated_fusion_kernel, dim_pad=dim_pad),
        out_shape=jax.ShapeDtypeStruct((B, out_pad), jnp.float32),
        grid=grid,
        in_specs=[
            row_spec((tb, input_dim)),   # x
            row_spec((tb, input_dim)),   # y
            full_spec(w1.shape),
            full_spec(b1.shape),
            full_spec(w2.shape),
            full_spec(b2.shape),
        ],
        out_specs=row_spec((tb, out_pad)),
        compiler_params=pltpu.CompilerParams(dimension_semantics=("parallel",)),
    )(x, y, w1, b1, w2, b2)

    # Split the packed slab back into the three module outputs (segment starts
    # are 128-lane aligned).
    out_x = packed[:, :output_dim]
    out_y = packed[:, out_seg : out_seg + output_dim]
    output = packed[:, 2 * out_seg : 2 * out_seg + output_dim]
    return out_x, out_y, output


def init_params(key, input_dim, dim, output_dim):
    """Deterministic synthetic init. Weights stored pre-transposed [in, out]."""
    ks = jax.random.split(key, 10)

    def w(k, i, o):
        return (jax.random.normal(k, (i, o), jnp.float32) * 0.05).astype(jnp.float32)

    def b(k, o):
        return (jax.random.normal(k, (1, o), jnp.float32) * 0.05).astype(jnp.float32)

    return {
        "w_x": w(ks[0], input_dim, dim),    "b_x": b(ks[1], dim),
        "w_y": w(ks[2], input_dim, dim),    "b_y": b(ks[3], dim),
        "w_out": w(ks[4], dim, output_dim), "b_out": b(ks[5], output_dim),
        "w_xo": w(ks[6], dim, output_dim),  "b_xo": b(ks[7], output_dim),
        "w_yo": w(ks[8], dim, output_dim),  "b_yo": b(ks[9], output_dim),
    }


def gated_fusion_ref(x, y, p):
    out_x_h = x @ p["w_x"] + p["b_x"]
    out_y_h = y @ p["w_y"] + p["b_y"]
    gate = jax.nn.sigmoid(out_x_h)
    output = (gate * out_y_h) @ p["w_out"] + p["b_out"]
    out_x = out_x_h @ p["w_xo"] + p["b_xo"]
    out_y = out_y_h @ p["w_yo"] + p["b_yo"]
    return out_x, out_y, output


if __name__ == "__main__":
    B, input_dim, dim, output_dim = 8, 32, 32, 16

    key = jax.random.PRNGKey(0)
    kx, ky, kp = jax.random.split(key, 3)
    x = jax.random.normal(kx, (B, input_dim), jnp.float32)
    y = jax.random.normal(ky, (B, input_dim), jnp.float32)
    params = init_params(kp, input_dim, dim, output_dim)

    out_x, out_y, output = jax.block_until_ready(gated_fusion(x, y, params))

    ref_x, ref_y, ref_out = gated_fusion_ref(x, y, params)
    assert jnp.allclose(out_x, ref_x, atol=1e-5, rtol=1e-5)
    assert jnp.allclose(out_y, ref_y, atol=1e-5, rtol=1e-5)
    assert jnp.allclose(output, ref_out, atol=1e-5, rtol=1e-5)

    print("KERNEL_OK")
</pallas_src>

<mosaic_0001>
module attributes {stable_mosaic.version = 11 : i64} {
  func.func @gated_fusion_kernel(%arg0: i32, %arg1: memref<8x32xf32, #tpu.memory_space<vmem>>, %arg2: memref<8x32xf32, #tpu.memory_space<vmem>>, %arg3: memref<64x256xf32, #tpu.memory_space<vmem>>, %arg4: memref<1x256xf32, #tpu.memory_space<vmem>>, %arg5: memref<384x384xf32, #tpu.memory_space<vmem>>, %arg6: memref<1x384xf32, #tpu.memory_space<vmem>>, %arg7: memref<8x384xf32, #tpu.memory_space<vmem>>) attributes {dimension_semantics = [#tpu.dimension_semantics<parallel>], iteration_bounds = array<i64: 1>, scalar_prefetch = 0 : i64, scratch_operands = 0 : i64, tpu.core_type = #tpu.core_type<tc>, window_params = [{transform_indices = @transform_0, window_bounds = array<i64: 8, 32>}, {transform_indices = @transform_1, window_bounds = array<i64: 8, 32>}, {pipeline_mode = #tpu.pipeline_mode<synchronous>, transform_indices = @transform_2, window_bounds = array<i64: 64, 256>}, {pipeline_mode = #tpu.pipeline_mode<synchronous>, transform_indices = @transform_3, window_bounds = array<i64: 1, 256>}, {pipeline_mode = #tpu.pipeline_mode<synchronous>, transform_indices = @transform_4, window_bounds = array<i64: 384, 384>}, {pipeline_mode = #tpu.pipeline_mode<synchronous>, transform_indices = @transform_5, window_bounds = array<i64: 1, 384>}, {transform_indices = @transform_6, window_bounds = array<i64: 8, 384>}]} {
    %c0 = arith.constant 0 : index
    %c0_0 = arith.constant 0 : index
    %0 = vector.load %arg1[%c0, %c0_0] : memref<8x32xf32, #tpu.memory_space<vmem>>, vector<8x32xf32>
    %c0_1 = arith.constant 0 : index
    %c0_2 = arith.constant 0 : index
    %1 = vector.load %arg2[%c0_1, %c0_2] : memref<8x32xf32, #tpu.memory_space<vmem>>, vector<8x32xf32>
    %2 = tpu.concatenate %0, %1 in 1 : vector<8x32xf32>, vector<8x32xf32> -> vector<8x64xf32>
    %c0_3 = arith.constant 0 : index
    %c0_4 = arith.constant 0 : index
    %3 = vector.load %arg3[%c0_3, %c0_4] : memref<64x256xf32, #tpu.memory_space<vmem>>, vector<64x256xf32>
    %cst = arith.constant dense<0.000000e+00> : vector<8x256xf32>
    %4 = tpu.matmul %2, %3, %cst {dimension_numbers = #tpu.dot_dimension_numbers<[1], [0], [0], [1], [0, 0, 1, 1], [], []>} : vector<8x64xf32>, vector<64x256xf32>, vector<8x256xf32> -> vector<8x256xf32>
    %c0_5 = arith.constant 0 : index
    %c0_6 = arith.constant 0 : index
    %5 = vector.load %arg4[%c0_5, %c0_6] : memref<1x256xf32, #tpu.memory_space<vmem>>, vector<1x256xf32>
    %6 = vector.broadcast %5 : vector<1x256xf32> to vector<8x256xf32>
    %7 = arith.addf %4, %6 : vector<8x256xf32>
    %8 = vector.extract_strided_slice %7 {offsets = [0, 0], sizes = [8, 128], strides = [1, 1]} : vector<8x256xf32> to vector<8x128xf32>
    %9 = vector.extract_strided_slice %7 {offsets = [0, 128], sizes = [8, 128], strides = [1, 1]} : vector<8x256xf32> to vector<8x128xf32>
    %10 = arith.negf %8 : vector<8x128xf32>
    %11 = math.exp %10 : vector<8x128xf32>
    %cst_7 = arith.constant 1.000000e+00 : f32
    %12 = vector.broadcast %cst_7 : f32 to vector<8x128xf32>
    %13 = arith.addf %12, %11 : vector<8x128xf32>
    %14 = arith.divf %12, %13 : vector<8x128xf32>
    %15 = arith.mulf %14, %9 : vector<8x128xf32>
    %16 = tpu.concatenate %7, %15 in 1 : vector<8x256xf32>, vector<8x128xf32> -> vector<8x384xf32>
    %c0_8 = arith.constant 0 : index
    %c0_9 = arith.constant 0 : index
    %17 = vector.load %arg5[%c0_8, %c0_9] : memref<384x384xf32, #tpu.memory_space<vmem>>, vector<384x384xf32>
    %cst_10 = arith.constant dense<0.000000e+00> : vector<8x384xf32>
    %18 = tpu.matmul %16, %17, %cst_10 {dimension_numbers = #tpu.dot_dimension_numbers<[1], [0], [0], [1], [0, 0, 1, 1], [], []>} : vector<8x384xf32>, vector<384x384xf32>, vector<8x384xf32> -> vector<8x384xf32>
    %c0_11 = arith.constant 0 : index
    %c0_12 = arith.constant 0 : index
    %19 = vector.load %arg6[%c0_11, %c0_12] : memref<1x384xf32, #tpu.memory_space<vmem>>, vector<1x384xf32>
    %20 = vector.broadcast %19 : vector<1x384xf32> to vector<8x384xf32>
    %21 = arith.addf %18, %20 : vector<8x384xf32>
    %c0_13 = arith.constant 0 : index
    %c0_14 = arith.constant 0 : index
    %22 = vector.load %arg7[%c0_13, %c0_14] : memref<8x384xf32, #tpu.memory_space<vmem>>, vector<8x384xf32>
    tpu.vector_store %arg7[%c0_13, %c0_14], %21 {strides = array<i32>} : memref<8x384xf32, #tpu.memory_space<vmem>>, vector<8x384xf32>,
    return
  }
  func.func @transform_0(%arg0: i32) -> (i32, i32) {
    %c0_i32 = arith.constant 0 : i32
    %c0_i32_0 = arith.constant 0 : i32
    return %arg0, %c0_i32 : i32, i32
  }
  func.func @transform_1(%arg0: i32) -> (i32, i32) {
    %c0_i32 = arith.constant 0 : i32
    %c0_i32_0 = arith.constant 0 : i32
    return %arg0, %c0_i32 : i32, i32
  }
  func.func @transform_2(%arg0: i32) -> (i32, i32) {
    %c0_i32 = arith.constant 0 : i32
    %c0_i32_0 = arith.constant 0 : i32
    %c0_i32_1 = arith.constant 0 : i32
    return %c0_i32, %c0_i32_0 : i32, i32
  }
  func.func @transform_3(%arg0: i32) -> (i32, i32) {
    %c0_i32 = arith.constant 0 : i32
    %c0_i32_0 = arith.constant 0 : i32
    %c0_i32_1 = arith.constant 0 : i32
    return %c0_i32, %c0_i32_0 : i32, i32
  }
  func.func @transform_4(%arg0: i32) -> (i32, i32) {
    %c0_i32 = arith.constant 0 : i32
    %c0_i32_0 = arith.constant 0 : i32
    %c0_i32_1 = arith.constant 0 : i32
    return %c0_i32, %c0_i32_0 : i32, i32
  }
  func.func @transform_5(%arg0: i32) -> (i32, i32) {
    %c0_i32 = arith.constant 0 : i32
    %c0_i32_0 = arith.constant 0 : i32
    %c0_i32_1 = arith.constant 0 : i32
    return %c0_i32, %c0_i32_0 : i32, i32
  }
  func.func @transform_6(%arg0: i32) -> (i32, i32) {
    %c0_i32 = arith.constant 0 : i32
    %c0_i32_0 = arith.constant 0 : i32
    return %arg0, %c0_i32 : i32, i32
  }
}

</mosaic_0001>

<bundles_post_ra>
// kernel: tpu_custom_call.1
= control target key start
LH: loop header
LB: loop body
LE: loop exit
PB: predicated region body
PF: predicated region fallthrough
CT: control target
= control target key end

     0   :  { %11 = vsyncpa [#allocation3], 0  ;;  %s793_s0 = inlined_call_operand.hbm [shape: f32[8,32], index: 0, kind: input, shape index: {}]   ;;  %s794_s1 = inlined_call_operand.hbm [shape: f32[8,32], index: 1, kind: input, shape index: {}]   ;;  %s795_s2 = inlined_call_operand.hbm [shape: f32[64,256], index: 2, kind: input, shape index: {}]   ;;  %s796_s3 = inlined_call_operand.hbm [shape: f32[1,256], index: 3, kind: input, shape index: {}]   ;;  %s797_s4 = inlined_call_operand.hbm [shape: f32[384,384], index: 4, kind: input, shape index: {}]   ;;  %s798_s5 = inlined_call_operand.vmem [shape: f32[1,384], index: 5, kind: input, shape index: {}]   ;;  %s799_s6 = inlined_call_operand.hbm [shape: f32[8,384], index: 6, kind: output, shape index: {}]  }
   0x1   :  { %12 = vsyncpa [#allocation6], 0 }
   0x2   :  { %13 = vsyncpa [#allocation9], 0  ;;  %s31_s23 = sshll.u32 %s794_s1, 4  ;;  %s32_s23 = int_to_ptr.hbm [resolvable:$true] %s31_s23 }
   0x3   :  { %14 = vsyncpa [#allocation4], 0  ;;  %s714_s24 = smov [#allocation5]   ;;  %s55_s28 = sshll.u32 %s796_s3, 4  ;;  %s56_s28 = int_to_ptr.hbm [resolvable:$true] %s55_s28 }
   0x4   :  { %s33_s25 = sshll.u32 %s714_s24, 4  ;;  %s715_s29 = smov [#allocation8]   ;;  %s34_s25 = int_to_ptr.vmem [resolvable:$true] %s33_s25 }
   0x5   :  { %36 = dma.hbm_to_vmem [thread:$0]  %s32_s23, 128, %s34_s25, [#allocation6]  }
   0x6   :  { %s57_s30 = sshll.u32 %s715_s29, 4  ;;  %s20_s9 = sshll.u32 %s793_s0, 4  ;;  %s58_s30 = int_to_ptr.vmem [resolvable:$true] %s57_s30  ;;  %s21_s9 = int_to_ptr.hbm [resolvable:$true] %s20_s9 }
   0x7   :  { %60 = dma.hbm_to_vmem [thread:$0]  %s56_s28, 32, %s58_s30, [#allocation9]  }
   0x8   :  { %s41_s11 = sshll.u32 %s795_s2, 4  ;;  %s716_s12 = smov [#allocation2]   ;;  %s42_s11 = int_to_ptr.hbm [resolvable:$true] %s41_s11 }
   0x9   :  { %s22_s13 = sshll.u32 %s716_s12, 4  ;;  %s717_s3 = smov [#allocation7]   ;;  %s23_s13 = int_to_ptr.vmem [resolvable:$true] %s22_s13 }
   0xa   :  { %25 = dma.hbm_to_vmem [thread:$0]  %s21_s9, 128, %s23_s13, [#allocation3]  }
   0xb   :  { %s43_s14 = sshll.u32 %s717_s3, 4  ;;  %s718_s15 = smov 256   ;;  %s44_s14 = int_to_ptr.vmem [resolvable:$true] %s43_s14 }
   0xc   :  { %s719_s16 = smov 16   ;;  %s65_s18 = sshll.u32 %s797_s4, 4  ;;  %s66_s18 = int_to_ptr.hbm [resolvable:$true] %s65_s18 }
   0xd   :  { %49 = dma.hbm_to_vmem [thread:$0]  %s42_s11, 2048, %s44_s14, [#allocation6], %s718_s15, %s718_s15, %s719_s16  }
   0xe   :  { %s720_s19 = smov [#allocation10]   ;;  %s721_s2 = smov 384  }
   0xf   :  { %s67_s20 = sshll.u32 %s720_s19, 4  ;;  %s722_s21 = smov 24   ;;  %s68_s20 = int_to_ptr.vmem [resolvable:$true] %s67_s20 }
  0x10   :  { %73 = dma.hbm_to_vmem [thread:$0]  %s66_s18, 18432, %s68_s20, [#allocation9], %s721_s2, %s721_s2, %s722_s21  }
  0x11   :  { %706 = dma.done.wait [#allocation3], 128  }
  0x12   :  { %707 = vsyncadd [#allocation3], 4294967168 }
  0x13   :  { %708 = dma.done.wait [#allocation6], 2176  }
  0x14   :  { %709 = vsyncadd [#allocation6], 4294965120 }
  0x15   :  { %710 = dma.done.wait [#allocation9], 18464  }
  0x16   :  { %711 = vsyncadd [#allocation9], 4294948832  ;;  %v97_v0 = vld [vmem:[#allocation5] sm:$0xff]  ;;  %v118_v1 = vld [vmem:[#allocation7 + $0x70] sm:$0xff]  ;;  %s723_s22 = smov 32   ;;  %vm102_vm0 = vcmask 261120  }
  0x17   :  { %v119_v2 = vld [vmem:[#allocation7 + $0x78] sm:$0xff]  ;;  %99 = vrot.lane.b32.xlu0 %v97_v0, %s723_s22  ;;  %138 = vmatpush.msra.mxu0 %v118_v1  ;;  %v116_v3 = vld [vmem:[#allocation7 + $0x60] sm:$0xff]  ;;  %v117_v4 = vld [vmem:[#allocation7 + $0x68] sm:$0xff]  ;;  %vm126_vm1 = vcmask 523264   ;;  %s532_s27 = sshll.u32 %s799_s6, 4  ;;  %s533_s27 = int_to_ptr.hbm [resolvable:$true] %s532_s27 }
  0x18   :  { %158 = vmatpush.msra.mxu1 %v119_v2  ;;  %v114_v5 = vld [vmem:[#allocation7 + $0x50] sm:$0xff]  ;;  %v115_v6 = vld [vmem:[#allocation7 + $0x58] sm:$0xff]  ;;  %v112_v7 = vld [vmem:[#allocation7 + $0x40] sm:$0xff] }
  0x19   :  { %139 = vmatpush.msra.mxu0 %v116_v3  ;;  %v113_v8 = vld [vmem:[#allocation7 + $0x48] sm:$0xff]  ;;  %v110_v9 = vld [vmem:[#allocation7 + $0x30] sm:$0xff]  ;;  %v111_v10 = vld [vmem:[#allocation7 + $0x38] sm:$0xff] }
  0x1a   :  { %159 = vmatpush.msra.mxu1 %v117_v4  ;;  %v108_v11 = vld [vmem:[#allocation7 + $0x20] sm:$0xff]  ;;  %v109_v12 = vld [vmem:[#allocation7 + $0x28] sm:$0xff]  ;;  %v106_v13 = vld [vmem:[#allocation7 + $0x10] sm:$0xff] }
  0x1b   :  { %140 = vmatpush.msra.mxu0 %v114_v5  ;;  %v107_v14 = vld [vmem:[#allocation7 + $0x18] sm:$0xff]  ;;  %v104_v15 = vld [vmem:[#allocation7] sm:$0xff]  ;;  %v105_v16 = vld [vmem:[#allocation7 + $0x8] sm:$0xff] }
  0x1c   :  { %160 = vmatpush.msra.mxu1 %v115_v6  ;;  %v235_v17 = vld [vmem:[#allocation10 + $0x168] sm:$0xff]  ;;  %v232_v18 = vld [vmem:[#allocation10 + $0x150] sm:$0xff]  ;;  %v229_v20 = vld [vmem:[#allocation10 + $0x138] sm:$0xff] }
  0x1d   :  { %141 = vmatpush.msra.mxu0 %v112_v7  ;;  %342 = vmatpush.msra.mxu2 %v235_v17  ;;  %v236_v19 = vld [vmem:[#allocation10 + $0x170] sm:$0xff]  ;;  %v233_v21 = vld [vmem:[#allocation10 + $0x158] sm:$0xff]  ;;  %v230_v22 = vld [vmem:[#allocation10 + $0x140] sm:$0xff] }
  0x1e   :  { %161 = vmatpush.msra.mxu1 %v113_v8  ;;  %v226_v23 = vld [vmem:[#allocation10 + $0x120] sm:$0xff]  ;;  %v227_v24 = vld [vmem:[#allocation10 + $0x128] sm:$0xff]  ;;  %v224_v26 = vld [vmem:[#allocation10 + $0x110] sm:$0xff] }
  0x1f   :  { %142 = vmatpush.msra.mxu0 %v110_v9  ;;  %343 = vmatpush.msra.mxu2 %v232_v18  ;;  %v223_v25 = vld [vmem:[#allocation10 + $0x108] sm:$0xff]  ;;  %v220_v27 = vld [vmem:[#allocation10 + $0xf0] sm:$0xff]  ;;  %v221_v28 = vld [vmem:[#allocation10 + $0xf8] sm:$0xff] }
  0x20   :  { %162 = vmatpush.msra.mxu1 %v111_v10  ;;  %v283_v29 = vld [vmem:[#allocation10 + $0x2e8] sm:$0xff]  ;;  %v217_v30 = vld [vmem:[#allocation10 + $0xd8] sm:$0xff]  ;;  %v280_v31 = vld [vmem:[#allocation10 + $0x2d0] sm:$0xff] }
  0x21   :  { %143 = vmatpush.msra.mxu0 %v108_v11  ;;  %344 = vmatpush.msra.mxu2 %v229_v20  ;;  %v218_v32 = vld [vmem:[#allocation10 + $0xe0] sm:$0xff]  ;;  %v277_v33 = vld [vmem:[#allocation10 + $0x2b8] sm:$0xff]  ;;  %v215_v35 = vld [vmem:[#allocation10 + $0xc8] sm:$0xff] }
  0x22   :  { %163 = vmatpush.msra.mxu1 %v109_v12  ;;  %362 = vmatpush.msra.mxu3 %v283_v29  ;;  %v214_v34 = vld [vmem:[#allocation10 + $0xc0] sm:$0xff]  ;;  %v331_v37 = vld [vmem:[#allocation10 + $0x468] sm:$0xff]  ;;  %v212_v39 = vld [vmem:[#allocation10 + $0xb0] sm:$0xff] }
  0x23   :  { %144 = vmatpush.msra.mxu0 %v106_v13  ;;  %345 = vmatpush.msra.mxu2 %v226_v23  ;;  %v274_v36 = vld [vmem:[#allocation10 + $0x2a0] sm:$0xff]  ;;  %v211_v38 = vld [vmem:[#allocation10 + $0xa8] sm:$0xff]  ;;  %v328_v41 = vld [vmem:[#allocation10 + $0x450] sm:$0xff] }
  0x24   :  { %164 = vmatpush.msra.mxu1 %v107_v14  ;;  %363 = vmatpush.msra.mxu3 %v280_v31  ;;  %v271_v40 = vld [vmem:[#allocation10 + $0x288] sm:$0xff]  ;;  %v208_v42 = vld [vmem:[#allocation10 + $0x90] sm:$0xff]  ;;  %v325_v43 = vld [vmem:[#allocation10 + $0x438] sm:$0xff] }
  0x25   :  { %145 = vmatpush.msra.mxu0 %v104_v15  ;;  %346 = vmatpush.msra.mxu2 %v223_v25  ;;  %v209_v44 = vld [vmem:[#allocation10 + $0x98] sm:$0xff]  ;;  %v268_v45 = vld [vmem:[#allocation10 + $0x270] sm:$0xff]  ;;  %v322_v47 = vld [vmem:[#allocation10 + $0x420] sm:$0xff] }
  0x26   :  { %165 = vmatpush.msra.mxu1 %v105_v16  ;;  %364 = vmatpush.msra.mxu3 %v277_v33  ;;  %v205_v46 = vld [vmem:[#allocation10 + $0x78] sm:$0xff]  ;;  %v206_v48 = vld [vmem:[#allocation10 + $0x80] sm:$0xff]  ;;  %v319_v51 = vld [vmem:[#allocation10 + $0x408] sm:$0xff] }
  0x27   :  { %347 = vmatpush.msra.mxu2 %v220_v27  ;;  %382 = vmatpush.msrb.mxu0 %v331_v37  ;;  %v265_v49 = vld [vmem:[#allocation10 + $0x258] sm:$0xff]  ;;  %v202_v50 = vld [vmem:[#allocation10 + $0x60] sm:$0xff]  ;;  %v203_v52 = vld [vmem:[#allocation10 + $0x68] sm:$0xff] }
  0x28   :  { %402 = vmatpush.msrb.mxu1 %v236_v19  ;;  %365 = vmatpush.msra.mxu3 %v274_v36  ;;  %v262_v53 = vld [vmem:[#allocation10 + $0x240] sm:$0xff]  ;;  %v199_v54 = vld [vmem:[#allocation10 + $0x48] sm:$0xff]  ;;  %v316_v55 = vld [vmem:[#allocation10 + $0x3f0] sm:$0xff] }
  0x29   :  { %348 = vmatpush.msra.mxu2 %v217_v30  ;;  %383 = vmatpush.msrb.mxu0 %v328_v41  ;;  %v200_v56 = vld [vmem:[#allocation10 + $0x50] sm:$0xff]  ;;  %v259_v57 = vld [vmem:[#allocation10 + $0x228] sm:$0xff]  ;;  %v313_v59 = vld [vmem:[#allocation10 + $0x3d8] sm:$0xff] }
  0x2a   :  { %403 = vmatpush.msrb.mxu1 %v233_v21  ;;  %366 = vmatpush.msra.mxu3 %v271_v40  ;;  %v196_v58 = vld [vmem:[#allocation10 + $0x30] sm:$0xff]  ;;  %v197_v60 = vld [vmem:[#allocation10 + $0x38] sm:$0xff]  ;;  %v310_v63 = vld [vmem:[#allocation10 + $0x3c0] sm:$0xff] }
  0x2b   :  { %349 = vmatpush.msra.mxu2 %v214_v34  ;;  %384 = vmatpush.msrb.mxu0 %v325_v43  ;;  %v256_v61 = vld [vmem:[#allocation10 + $0x210] sm:$0xff]  ;;  %v193_v62 = vld [vmem:[#allocation10 + $0x18] sm:$0xff]  ;;  %v194_v0 = vld [vmem:[#allocation10 + $0x20] sm:$0xff] }
  0x2c   :  { %404 = vmatpush.msrb.mxu1 %v230_v22  ;;  %367 = vmatpush.msra.mxu3 %v268_v45  ;;  %v253_v1 = vld [vmem:[#allocation10 + $0x1f8] sm:$0xff]  ;;  %v96_v2 = vld [vmem:[#allocation2] sm:$0xff]  ;;  %v190_v3 = vld [vmem:[#allocation10] sm:$0xff] }
  0x2d   :  { %350 = vmatpush.msra.mxu2 %v211_v38  ;;  %385 = vmatpush.msrb.mxu0 %v322_v47  ;;  %v307_v4 = vld [vmem:[#allocation10 + $0x3a8] sm:$0xff]  ;;  %v284_v6 = vld [vmem:[#allocation10 + $0x2f0] sm:$0xff]  ;;  %v285_v9 = vld [vmem:[#allocation10 + $0x2f8] sm:$0xff] }
  0x2e   :  { %405 = vmatpush.msrb.mxu1 %v227_v24  ;;  %368 = vmatpush.msra.mxu3 %v265_v49  ;;  %v191_v7 = vld [vmem:[#allocation10 + $0x8] sm:$0xff]  ;;  %v250_v10 = vld [vmem:[#allocation10 + $0x1e0] sm:$0xff]  ;;  %v281_v11 = vld [vmem:[#allocation10 + $0x2d8] sm:$0xff] }
  0x2f   :  { %351 = vmatpush.msra.mxu2 %v208_v42  ;;  %386 = vmatpush.msrb.mxu0 %v319_v51  ;;  %v304_v12 = vld [vmem:[#allocation10 + $0x390] sm:$0xff]  ;;  %v282_v13 = vld [vmem:[#allocation10 + $0x2e0] sm:$0xff]  ;;  %v247_v14 = vld [vmem:[#allocation10 + $0x1c8] sm:$0xff] }
  0x30   :  { %406 = vmatpush.msrb.mxu1 %v224_v26  ;;  %369 = vmatpush.msra.mxu3 %v262_v53  ;;  %v278_v15 = vld [vmem:[#allocation10 + $0x2c0] sm:$0xff]  ;;  %v301_v16 = vld [vmem:[#allocation10 + $0x378] sm:$0xff]  ;;  %v279_v17 = vld [vmem:[#allocation10 + $0x2c8] sm:$0xff] }
  0x31   :  { %352 = vmatpush.msra.mxu2 %v205_v46  ;;  %387 = vmatpush.msrb.mxu0 %v316_v55  ;;  %v244_v18 = vld [vmem:[#allocation10 + $0x1b0] sm:$0xff]  ;;  %v275_v19 = vld [vmem:[#allocation10 + $0x2a8] sm:$0xff]  ;;  %v241_v21 = vld [vmem:[#allocation10 + $0x198] sm:$0xff] }
  0x32   :  { %407 = vmatpush.msrb.mxu1 %v221_v28  ;;  %370 = vmatpush.msra.mxu3 %v259_v57  ;;  %v276_v20 = vld [vmem:[#allocation10 + $0x2b0] sm:$0xff]  ;;  %v273_v23 = vld [vmem:[#allocation10 + $0x298] sm:$0xff]  ;;  %v270_v25 = vld [vmem:[#allocation10 + $0x280] sm:$0xff] }
  0x33   :  { %353 = vmatpush.msra.mxu2 %v202_v50  ;;  %388 = vmatpush.msrb.mxu0 %v313_v59  ;;  %v272_v22 = vld [vmem:[#allocation10 + $0x290] sm:$0xff]  ;;  %v269_v24 = vld [vmem:[#allocation10 + $0x278] sm:$0xff]  ;;  %v266_v26 = vld [vmem:[#allocation10 + $0x260] sm:$0xff] }
  0x34   :  { %408 = vmatpush.msrb.mxu1 %v218_v32  ;;  %371 = vmatpush.msra.mxu3 %v256_v61  ;;  %v267_v27 = vld [vmem:[#allocation10 + $0x268] sm:$0xff]  ;;  %v264_v29 = vld [vmem:[#allocation10 + $0x250] sm:$0xff]  ;;  %v261_v31 = vld [vmem:[#allocation10 + $0x238] sm:$0xff] }
  0x35   :  { %354 = vmatpush.msra.mxu2 %v199_v54  ;;  %389 = vmatpush.msrb.mxu0 %v310_v63  ;;  %v263_v28 = vld [vmem:[#allocation10 + $0x248] sm:$0xff]  ;;  %v260_v30 = vld [vmem:[#allocation10 + $0x230] sm:$0xff]  ;;  %v257_v32 = vld [vmem:[#allocation10 + $0x218] sm:$0xff] }
  0x36   :  { %409 = vmatpush.msrb.mxu1 %v215_v35  ;;  %372 = vmatpush.msra.mxu3 %v253_v1  ;;  %v258_v33 = vld [vmem:[#allocation10 + $0x220] sm:$0xff]  ;;  %v251_v35 = vld [vmem:[#allocation10 + $0x1e8] sm:$0xff]  ;;  %v248_v36 = vld [vmem:[#allocation10 + $0x1d0] sm:$0xff] }
  0x37   :  { %355 = vmatpush.msra.mxu2 %v196_v58  ;;  %390 = vmatpush.msrb.mxu0 %v307_v4  ;;  %v254_v34 = vld [vmem:[#allocation10 + $0x200] sm:$0xff]  ;;  %v245_v37 = vld [vmem:[#allocation10 + $0x1b8] sm:$0xff]  ;;  %v239_v42 = vld [vmem:[#allocation10 + $0x188] sm:$0xff] }
  0x38   :  { %410 = vmatpush.msrb.mxu1 %v212_v39  ;;  %373 = vmatpush.msra.mxu3 %v250_v10  ;;  %v242_v38 = vld [vmem:[#allocation10 + $0x1a0] sm:$0xff]  ;;  %v255_v39 = vld [vmem:[#allocation10 + $0x208] sm:$0xff]  ;;  %v332_v43 = vld [vmem:[#allocation10 + $0x470] sm:$0xff] }
  0x39   :  { %356 = vmatpush.msra.mxu2 %v193_v62  ;;  %391 = vmatpush.msrb.mxu0 %v304_v12  ;;  %v238_v40 = vld [vmem:[#allocation10 + $0x180] sm:$0xff]  ;;  %v295_v45 = vld [vmem:[#allocation10 + $0x348] sm:$0xff]  ;;  %v329_v46 = vld [vmem:[#allocation10 + $0x458] sm:$0xff] }
  0x3a   :  { %411 = vmatpush.msrb.mxu1 %v209_v44  ;;  %374 = vmatpush.msra.mxu3 %v247_v14  ;;  %v298_v41 = vld [vmem:[#allocation10 + $0x360] sm:$0xff]  ;;  %v252_v44 = vld [vmem:[#allocation10 + $0x1f0] sm:$0xff]  ;;  %v249_v47 = vld [vmem:[#allocation10 + $0x1d8] sm:$0xff] }
  0x3b   :  { %357 = vmatpush.msra.mxu2 %v190_v3  ;;  %392 = vmatpush.msrb.mxu0 %v301_v16  ;;  %v326_v49 = vld [vmem:[#allocation10 + $0x440] sm:$0xff]  ;;  %v289_v51 = vld [vmem:[#allocation10 + $0x318] sm:$0xff]  ;;  %v243_v53 = vld [vmem:[#allocation10 + $0x1a8] sm:$0xff] }
  0x3c   :  { %412 = vmatpush.msrb.mxu1 %v206_v48  ;;  %375 = vmatpush.msra.mxu3 %v244_v18  ;;  %v292_v48 = vld [vmem:[#allocation10 + $0x330] sm:$0xff]  ;;  %v246_v50 = vld [vmem:[#allocation10 + $0x1c0] sm:$0xff]  ;;  %v317_v58 = vld [vmem:[#allocation10 + $0x3f8] sm:$0xff] }
  0x3d   :  { %422 = vmatpush.msrb.mxu2 %v284_v6  ;;  %393 = vmatpush.msrb.mxu0 %v298_v41  ;;  %v286_v54 = vld [vmem:[#allocation10 + $0x300] sm:$0xff]  ;;  %v320_v55 = vld [vmem:[#allocation10 + $0x410] sm:$0xff]  ;;  %v231_v61 = vld [vmem:[#allocation10 + $0x148] sm:$0xff] }
  0x3e   :  { %413 = vmatpush.msrb.mxu1 %v203_v52  ;;  %376 = vmatpush.msra.mxu3 %v241_v21  ;;  %v323_v52 = vld [vmem:[#allocation10 + $0x428] sm:$0xff]  ;;  %v240_v57 = vld [vmem:[#allocation10 + $0x190] sm:$0xff]  ;;  %v234_v59 = vld [vmem:[#allocation10 + $0x160] sm:$0xff] }
  0x3f   :  { %423 = vmatpush.msrb.mxu2 %v281_v11  ;;  %394 = vmatpush.msrb.mxu0 %v295_v45  ;;  %v311_v62 = vld [vmem:[#allocation10 + $0x3c8] sm:$0xff]  ;;  %v228_v63 = vld [vmem:[#allocation10 + $0x130] sm:$0xff]  ;;  %v225_v1 = vld [vmem:[#allocation10 + $0x118] sm:$0xff] }
  0x40   :  { %414 = vmatpush.msrb.mxu1 %v200_v56  ;;  %377 = vmatpush.msra.mxu3 %v238_v40  ;;  %v237_v56 = vld [vmem:[#allocation10 + $0x178] sm:$0xff]  ;;  %v222_v3 = vld [vmem:[#allocation10 + $0x100] sm:$0xff]  ;;  %v299_v6 = vld [vmem:[#allocation10 + $0x368] sm:$0xff] }
  0x41   :  { %424 = vmatpush.msrb.mxu2 %v278_v15  ;;  %395 = vmatpush.msrb.mxu0 %v292_v48  ;;  %v302_v4 = vld [vmem:[#allocation10 + $0x380] sm:$0xff]  ;;  %v213_v10 = vld [vmem:[#allocation10 + $0xb8] sm:$0xff]  ;;  %v207_v16 = vld [vmem:[#allocation10 + $0x88] sm:$0xff] }
  0x42   :  { %415 = vmatpush.msrb.mxu1 %v197_v60  ;;  %442 = vmatpush.msrb.mxu3 %v332_v43  ;;  %v314_v60 = vld [vmem:[#allocation10 + $0x3e0] sm:$0xff]  ;;  %v293_v11 = vld [vmem:[#allocation10 + $0x338] sm:$0xff]  ;;  %v303_v41 = vld [vmem:[#allocation10 + $0x388] sm:$0xff] }
  0x43   :  { %425 = vmatpush.msrb.mxu2 %v275_v19  ;;  %396 = vmatpush.msrb.mxu0 %v289_v51  ;;  %v210_v12 = vld [vmem:[#allocation10 + $0xa0] sm:$0xff]  ;;  %v287_v19 = vld [vmem:[#allocation10 + $0x308] sm:$0xff]  ;;  %v300_v43 = vld [vmem:[#allocation10 + $0x370] sm:$0xff] }
  0x44   :  { %416 = vmatpush.msrb.mxu1 %v194_v0  ;;  %443 = vmatpush.msrb.mxu3 %v329_v46  ;;  %v308_v0 = vld [vmem:[#allocation10 + $0x3b0] sm:$0xff]  ;;  %v290_v15 = vld [vmem:[#allocation10 + $0x320] sm:$0xff]  ;;  %v297_v46 = vld [vmem:[#allocation10 + $0x358] sm:$0xff] }
  0x45   :  { %426 = vmatpush.msrb.mxu2 %v272_v22  ;;  %397 = vmatpush.msrb.mxu0 %v286_v54 }
  0x46   :  { %417 = vmatpush.msrb.mxu1 %v191_v7  ;;  %444 = vmatpush.msrb.mxu3 %v326_v49  ;;  %v216_v7 = vld [vmem:[#allocation10 + $0xd0] sm:$0xff]  ;;  %v294_v49 = vld [vmem:[#allocation10 + $0x340] sm:$0xff] }
  0x47   :  { %427 = vmatpush.msrb.mxu2 %v269_v24  ;;  %v201_v24 = vld [vmem:[#allocation10 + $0x58] sm:$0xff] }
  0x48   :  { %445 = vmatpush.msrb.mxu3 %v323_v52  ;;  %v291_v52 = vld [vmem:[#allocation10 + $0x328] sm:$0xff] }
  0x49   :  { %428 = vmatpush.msrb.mxu2 %v266_v26  ;;  %v330_v26 = vld [vmem:[#allocation10 + $0x460] sm:$0xff] }
  0x4a   :  { %446 = vmatpush.msrb.mxu3 %v320_v55 }
  0x4b   :  { %429 = vmatpush.msrb.mxu2 %v263_v28  ;;  %v327_v28 = vld [vmem:[#allocation10 + $0x448] sm:$0xff] }
  0x4c   :  { %447 = vmatpush.msrb.mxu3 %v317_v58 }
  0x4d   :  { %430 = vmatpush.msrb.mxu2 %v260_v30  ;;  %v324_v30 = vld [vmem:[#allocation10 + $0x430] sm:$0xff] }
  0x4e   :  { %448 = vmatpush.msrb.mxu3 %v314_v60 }
  0x4f   :  { %431 = vmatpush.msrb.mxu2 %v257_v32  ;;  %v321_v32 = vld [vmem:[#allocation10 + $0x418] sm:$0xff] }
  0x50   :  { %449 = vmatpush.msrb.mxu3 %v311_v62 }
  0x51   :  { %432 = vmatpush.msrb.mxu2 %v254_v34  ;;  %v318_v34 = vld [vmem:[#allocation10 + $0x400] sm:$0xff] }
  0x52   :  { %450 = vmatpush.msrb.mxu3 %v308_v0 }
  0x53   :  { %433 = vmatpush.msrb.mxu2 %v251_v35 }
  0x55   :  { %434 = vmatpush.msrb.mxu2 %v248_v36  ;;  %v315_v36 = vld [vmem:[#allocation10 + $0x3e8] sm:$0xff] }
  0x57   :  { %435 = vmatpush.msrb.mxu2 %v245_v37  ;;  %v312_v37 = vld [vmem:[#allocation10 + $0x3d0] sm:$0xff] }
  0x59   :  { %436 = vmatpush.msrb.mxu2 %v242_v38  ;;  %v309_v38 = vld [vmem:[#allocation10 + $0x3b8] sm:$0xff] }
  0x5b   :  { %437 = vmatpush.msrb.mxu2 %v239_v42 }
  0x89   :  { %v100_v5 = vpop.permute.xlu0 %99 }
  0x8a   :  { %v103_v8 = vsel %vm102_vm0, %v96_v2, %v100_v5  ;;  %v305_v2 = vld [vmem:[#allocation10 + $0x398] sm:$0xff]  ;;  %v219_v5 = vld [vmem:[#allocation10 + $0xe8] sm:$0xff] }
  0x8b   :  { %544 = vmatmul.msk.f32.vlgmr.msra.gmra.mxu0 %vm126_vm1, %v103_v8  ;;  %545 = vmatmul.msk.f32.vlgmr.msra.gmra.mxu1 %vm126_vm1, %v103_v8  ;;  %v120_v8 = vld [vmem:[#allocation8] sm:$0x3] }
  0x8c   :  { %482 = vmatpush.msra.mxu1 %v285_v9  ;;  %462 = vmatpush.msra.mxu0 %v237_v56  ;;  %v296_v9 = vld [vmem:[#allocation10 + $0x350] sm:$0xff]  ;;  %v123_v14 = vperm.slane %v120_v8, 1 }
  0x8d   :  { %451 = vmatpush.msrb.mxu3 %v305_v2  ;;  %v288_v56 = vld [vmem:[#allocation10 + $0x310] sm:$0xff] }
  0x8e   :  { %483 = vmatpush.msra.mxu1 %v282_v13  ;;  %463 = vmatpush.msra.mxu0 %v234_v59  ;;  %v122_v13 = vperm.slane %v120_v8, 0 }
  0x8f   :  { %452 = vmatpush.msrb.mxu3 %v302_v4 }
  0x90   :  { %484 = vmatpush.msra.mxu1 %v279_v17  ;;  %464 = vmatpush.msra.mxu0 %v231_v61 }
  0x91   :  { %453 = vmatpush.msrb.mxu3 %v299_v6 }
  0x92   :  { %485 = vmatpush.msra.mxu1 %v276_v20  ;;  %465 = vmatpush.msra.mxu0 %v228_v63  ;;  %v204_v20 = vld [vmem:[#allocation10 + $0x70] sm:$0xff] }
  0x93   :  { %454 = vmatpush.msrb.mxu3 %v296_v9 }
  0x94   :  { %486 = vmatpush.msra.mxu1 %v273_v23  ;;  %466 = vmatpush.msra.mxu0 %v225_v1  ;;  %v333_v23 = vld [vmem:[#allocation10 + $0x478] sm:$0xff] }
  0x95   :  { %455 = vmatpush.msrb.mxu3 %v293_v11 }
  0x96   :  { %487 = vmatpush.msra.mxu1 %v270_v25  ;;  %467 = vmatpush.msra.mxu0 %v222_v3 }
  0x97   :  { %456 = vmatpush.msrb.mxu3 %v290_v15 }
  0x98   :  { %488 = vmatpush.msra.mxu1 %v267_v27  ;;  %468 = vmatpush.msra.mxu0 %v219_v5  ;;  %v198_v27 = vld [vmem:[#allocation10 + $0x40] sm:$0xff] }
  0x99   :  { %457 = vmatpush.msrb.mxu3 %v287_v19 }
  0x9a   :  { %489 = vmatpush.msra.mxu1 %v264_v29  ;;  %469 = vmatpush.msra.mxu0 %v216_v7  ;;  %v195_v29 = vld [vmem:[#allocation10 + $0x28] sm:$0xff] }
  0x9c   :  { %490 = vmatpush.msra.mxu1 %v261_v31  ;;  %470 = vmatpush.msra.mxu0 %v213_v10  ;;  %v192_v31 = vld [vmem:[#allocation10 + $0x10] sm:$0xff] }
  0x9e   :  { %491 = vmatpush.msra.mxu1 %v258_v33  ;;  %471 = vmatpush.msra.mxu0 %v210_v12 }
  0xa0   :  { %492 = vmatpush.msra.mxu1 %v255_v39  ;;  %472 = vmatpush.msra.mxu0 %v207_v16  ;;  %v306_v39 = vld [vmem:[#allocation10 + $0x3a0] sm:$0xff] }
  0xa2   :  { %493 = vmatpush.msra.mxu1 %v252_v44  ;;  %473 = vmatpush.msra.mxu0 %v204_v20 }
  0xa4   :  { %494 = vmatpush.msra.mxu1 %v249_v47  ;;  %474 = vmatpush.msra.mxu0 %v201_v24 }
  0xa6   :  { %495 = vmatpush.msra.mxu1 %v246_v50  ;;  %475 = vmatpush.msra.mxu0 %v198_v27 }
  0xa8   :  { %496 = vmatpush.msra.mxu1 %v243_v53  ;;  %476 = vmatpush.msra.mxu0 %v195_v29 }
  0xaa   :  { %497 = vmatpush.msra.mxu1 %v240_v57  ;;  %477 = vmatpush.msra.mxu0 %v192_v31  ;;  %v334_v57 = vld [vmem:[%s798_s5] sm:$0x7]  ;;  %s724_s5 = smov [#allocation11]  }
  0xab   :  { %v336_v58 = vperm.slane %v334_v57, 0  ;;  %v337_v62 = vperm.slane %v334_v57, 1  ;;  %v338_v6 = vperm.slane %v334_v57, 2  ;;  %s530_s24 = sshll.u32 %s724_s5, 4  ;;  %s531_s24 = int_to_ptr.vmem [resolvable:$true] %s530_s24 }
 0x108   :  { %v147_v17 = vpop.f32.mrf.mxu0  ;;  %v167_v18 = vpop.f32.mrf.mxu1 }
 0x109   :  { %v775_v21 = vadd.f32 %v147_v17, %v122_v13  ;;  %v777_v22 = vadd.f32 %v167_v18, %v123_v14 }
 0x10b   :  { %v546_v25 = vmul.f32 -1.442695, %v775_v21  ;;  %358 = vmatmul.f32.vlgmr.msra.gmra.mxu2 %v775_v21  ;;  %378 = vmatmul.f32.vlgmr.msra.gmra.mxu3 %v777_v22 }
 0x10c   :  { %418 = vmatmul.f32.vlgmr.msrb.gmra.mxu1 %v775_v21  ;;  %502 = vmatpush.msra.mxu2 %v333_v23 }
 0x10d   :  { %558 = vpow2.f32 %v546_v25 }
 0x10e   :  { %503 = vmatpush.msra.mxu2 %v330_v26 }
 0x110   :  { %504 = vmatpush.msra.mxu2 %v327_v28 }
 0x112   :  { %505 = vmatpush.msra.mxu2 %v324_v30 }
 0x113   :  { %v559_v33 = vpop.eup %558  ;;  %438 = vmatmul.f32.vlgmr.msrb.gmra.mxu2 %v777_v22 }
 0x114   :  { %v173_v35 = vadd.f32 1.0, %v559_v33  ;;  %498 = vmatmul.f32.vlgmr.msra.gmra.mxu1 %v777_v22  ;;  %506 = vmatpush.msra.mxu2 %v321_v32 }
 0x116   :  { %560 = vrcp.f32 %v173_v35  ;;  %507 = vmatpush.msra.mxu2 %v318_v34  ;;  %v185_v45 = vand.u32 2147483648, %v173_v35  ;;  %v183_v48 = vand.u32 2147483647, %v173_v35  ;;  %vm179_vm3 = vweird.f32 %v173_v35 }
 0x118   :  { %508 = vmatpush.msra.mxu2 %v315_v36  ;;  %v186_v51 = vor.u32 1.1754944e-38, %v185_v45  ;;  %vm184_vm5 = vcmp.eq.f32.partialorder %v183_v48, 8.507059e+37 }
 0x11a   :  { %509 = vmatpush.msra.mxu2 %v312_v37 }
 0x11c   :  { %v561_v40 = vpop.eup %560  ;;  %510 = vmatpush.msra.mxu2 %v309_v38 }
 0x11d   :  { %v175_v42 = vmul.f32 %v561_v40, %v173_v35  ;;  %vm180_vm2 = vweird.f32 %v561_v40 }
 0x11e   :  { %511 = vmatpush.msra.mxu2 %v306_v39  ;;  %vm181_vm4 = vmor %vm179_vm3, %vm180_vm2 }
 0x11f   :  { %v176_v44 = vsub.f32 1.0, %v175_v42 }
 0x120   :  { %512 = vmatpush.msra.mxu2 %v303_v41 }
 0x121   :  { %v177_v47 = vmul.f32 %v561_v40, %v176_v44 }
 0x122   :  { %513 = vmatpush.msra.mxu2 %v300_v43 }
 0x123   :  { %v178_v50 = vadd.f32 %v561_v40, %v177_v47 }
 0x124   :  { %514 = vmatpush.msra.mxu2 %v297_v46 }
 0x125   :  { %v182_v53 = vsel %vm181_vm4, %v561_v40, %v178_v50 }
 0x126   :  { %515 = vmatpush.msra.mxu2 %v294_v49  ;;  %v187_v54 = vsel %vm184_vm5, %v186_v51, %v182_v53 }
 0x127   :  { %v189_v55 = vmul.f32 %v187_v54, %v777_v22 }
 0x128   :  { %516 = vmatpush.msra.mxu2 %v291_v52 }
 0x129   :  { %398 = vmatmul.f32.vlgmr.msrb.gmra.mxu0 %v189_v55  ;;  %458 = vmatmul.f32.vlgmr.msrb.gmra.mxu3 %v189_v55 }
 0x12a   :  { %517 = vmatpush.msra.mxu2 %v288_v56 }
 0x12b   :  { %518 = vmatmul.f32.vlgmr.msra.gmra.mxu2 %v189_v55 }
 0x131   :  { %478 = vmatmul.f32.vlgmr.msra.gmra.mxu0 %v775_v21 }
 0x189   :  { %v419_v0 = vpop.f32.mrf.mxu1 }
 0x18a   :  { %v420_v4 = vadd.f32 %v419_v0, %v337_v62 }
 0x18e   :  { %v359_v59 = vpop.f32.mrf.mxu2  ;;  %v379_v61 = vpop.f32.mrf.mxu3 }
 0x18f   :  { %v360_v60 = vadd.f32 %v359_v59, %v336_v58 }
 0x191   :  { %v380_v63 = vadd.f32 %v379_v61, %v360_v60  ;;  %v499_v11 = vpop.f32.mrf.mxu1 }
 0x196   :  { %v439_v3 = vpop.f32.mrf.mxu2 }
 0x197   :  { %v440_v5 = vadd.f32 %v439_v3, %v420_v4 }
 0x1a6   :  { %v399_v1 = vpop.f32.mrf.mxu0 }
 0x1a7   :  { %v400_v2 = vadd.f32 %v399_v1, %v380_v63 }
 0x1a9   :  { %522 = vst [vmem:[#allocation11] sm:$0xff] %v400_v2 }
 0x1ac   :  { %v459_v7 = vpop.f32.mrf.mxu3 }
 0x1ad   :  { %v460_v8 = vadd.f32 %v459_v7, %v440_v5 }
 0x1ae   :  { %v479_v9 = vpop.f32.mrf.mxu0  ;;  %v519_v13 = vpop.f32.mrf.mxu2 }
 0x1af   :  { %523 = vst [vmem:[#allocation11 + $0x8] sm:$0xff] %v460_v8  ;;  %v480_v10 = vadd.f32 %v479_v9, %v338_v6 }
 0x1b1   :  { %v500_v12 = vadd.f32 %v499_v11, %v480_v10 }
 0x1b3   :  { %v520_v14 = vadd.f32 %v519_v13, %v500_v12 }
 0x1b5   :  { %524 = vst [vmem:[#allocation11 + $0x10] sm:$0xff] %v520_v14 }
 0x1b6   :  { %535 = dma.vmem_to_hbm [thread:$0]  %s531_s24, 384, %s533_s27, [#allocation4]  }
 0x1b7   :  { %712 = dma.done.wait [#allocation4], 384  }
 0x1b8   :  { %713 = vsyncadd [#allocation4], 4294966912 }
 0x1b9   :  { %540 = vsyncpa [#allocation3], 1 }
 0x1ba   :  { %541 = vsyncpa [#allocation6], 1 }
 0x1bb   :  { %542 = vsyncpa [#allocation9], 1 }
 0x1bc   :  { %543 = vsyncpa [#allocation4], 1 }

</bundles_post_ra>
